<compile_context>
chip_gen: v7x
topology: tpu7x:2x2x1
jax: 0.10.0
libtpu: 0.0.40
codegen_flags: <defaults>
</compile_context>

<pallas_src>
import jax
import jax.numpy as jnp
from jax.experimental import pallas as pl
from jax.experimental.pallas import tpu as pltpu


def _round_up(a, b):
    return ((a + b - 1) // b) * b


def _balanced_tile(dim, cap, align):
    """Largest tile <= cap that splits round_up(dim, align) into near-equal,
    align-multiple blocks (avoids ~2x padded work when dim is just over cap)."""
    a = _round_up(max(int(dim), 1), align)
    if a <= cap:
        return a
    nblocks = -(-a // cap)
    return _round_up(-(-a // nblocks), align)


def _vmem_limit_bytes():
    """Per-generation scoped-VMEM limit. v7x only has 64 MiB physical per TC."""
    kind = ""
    try:
        kind = jax.devices()[0].device_kind.lower()
    except Exception:
        pass
    if "v7" in kind:
        return 48 * 1024 * 1024
    if "v5" in kind or "v6" in kind:
        return 96 * 1024 * 1024
    return 32 * 1024 * 1024          # conservative fallback (still >= defaults)


def _kn_tiling(d_in, d_h, itemsize):
    """K/N tile sizes and padded extents.  Depends only on the weight shapes and
    dtype (NOT on M), so pack-time and call-time padding always agree."""
    tk_cap = 4096 if itemsize <= 2 else 2048      # prefer a single full-K tile
    tk = _balanced_tile(d_in, tk_cap, 128)
    tn = _balanced_tile(d_h, 512, 128)            # lane-dense (>=128) output tiles
    k_pad = _round_up(d_in, tk)
    n_pad = _round_up(d_h, tn)
    return tk, tn, k_pad, n_pad


def _pick_tm(m, tk, tn, itemsize, multi_k, vmem_budget):
    """Balanced M tile, shrunk (only tm) until the double-buffered footprint fits."""
    tm = _balanced_tile(m, 512, 8)

    def footprint(t):
        f = 2 * t * tk * itemsize            # x tile, double-buffered
        f += 2 * 3 * tk * tn * itemsize      # wq/wk/wv tiles
        f += 2 * 3 * t * tn * itemsize       # q/k/v output tiles
        f += 2 * 3 * tn * 4                  # f32 bias tiles
        if multi_k:
            f += 3 * t * tn * 4              # f32 accumulators
        return f

    while tm > 8 and footprint(tm) > vmem_budget:
        tm = _round_up(tm // 2, 8)
    return tm


# ---------------------------------------------------------------------------
# Kernels
# ---------------------------------------------------------------------------

def _qkv_kernel_single(x_ref, wq_ref, wk_ref, wv_ref, bq_ref, bk_ref, bv_ref,
                       q_ref, k_ref, v_ref):
    """Single K tile: no accumulator scratch, write biased results directly."""
    x = x_ref[...]
    q_ref[...] = (jnp.dot(x, wq_ref[...], preferred_element_type=jnp.float32)
                  + bq_ref[...]).astype(q_ref.dtype)
    k_ref[...] = (jnp.dot(x, wk_ref[...], preferred_element_type=jnp.float32)
                  + bk_ref[...]).astype(k_ref.dtype)
    v_ref[...] = (jnp.dot(x, wv_ref[...], preferred_element_type=jnp.float32)
                  + bv_ref[...]).astype(v_ref.dtype)


def _qkv_kernel_multi(x_ref, wq_ref, wk_ref, wv_ref, bq_ref, bk_ref, bv_ref,
                      q_ref, k_ref, v_ref, accq, acck, accv):
    """K split over the innermost grid axis: resident f32 accumulators."""
    ks = pl.program_id(2)

    @pl.when(ks == 0)
    def _():
        accq[...] = jnp.zeros_like(accq)
        acck[...] = jnp.zeros_like(acck)
        accv[...] = jnp.zeros_like(accv)

    x = x_ref[...]
    accq[...] += jnp.dot(x, wq_ref[...], preferred_element_type=jnp.float32)
    acck[...] += jnp.dot(x, wk_ref[...], preferred_element_type=jnp.float32)
    accv[...] += jnp.dot(x, wv_ref[...], preferred_element_type=jnp.float32)

    @pl.when(ks == pl.num_programs(2) - 1)
    def _():
        q_ref[...] = (accq[...] + bq_ref[...]).astype(q_ref.dtype)
        k_ref[...] = (acck[...] + bk_ref[...]).astype(k_ref.dtype)
        v_ref[...] = (accv[...] + bv_ref[...]).astype(v_ref.dtype)


# ---------------------------------------------------------------------------
# Packing + forward wrapper
# ---------------------------------------------------------------------------

def pack_qkv_params(params, dtype=None):
    """One-time weight packing (do NOT call per forward): transpose the PyTorch
    (out, in) weights to (D_in, D_h), cast to the compute dtype (bf16 recommended
    for production), and pad to the shared (8,128)-aligned tiling."""
    d_h, d_in = params["wq"].shape
    dtype = jnp.dtype(dtype if dtype is not None else params["wq"].dtype)
    tk, tn, k_pad, n_pad = _kn_tiling(d_in, d_h, dtype.itemsize)

    def pack_w(w):
        w = w.T.astype(dtype)
        return jnp.pad(w, ((0, k_pad - d_in), (0, n_pad - d_h)))

    def pack_b(b):
        return jnp.pad(b.astype(jnp.float32), (0, n_pad - d_h))[None, :]

    return {
        "wq": pack_w(params["wq"]), "wk": pack_w(params["wk"]), "wv": pack_w(params["wv"]),
        "bq": pack_b(params["bq"]), "bk": pack_b(params["bk"]), "bv": pack_b(params["bv"]),
        "d_in": int(d_in), "d_h": int(d_h), "dtype": dtype,
        "tk": tk, "tn": tn, "k_pad": k_pad, "n_pad": n_pad,
    }


def transformer_layer_forward(x, packed):
    """x: [B, S, D_in] -> (q, k, v), each [B, S, D_h]."""
    B, S, d_in = x.shape
    assert d_in == packed["d_in"], "input feature dim mismatch with packed weights"
    d_h = packed["d_h"]
    M = B * S

    w_dtype = packed["dtype"]
    tk, tn = packed["tk"], packed["tn"]
    k_pad, n_pad = packed["k_pad"], packed["n_pad"]
    itemsize = w_dtype.itemsize
    multi_k = k_pad > tk

    vmem_limit = _vmem_limit_bytes()
    tm = _pick_tm(M, tk, tn, itemsize, multi_k, vmem_limit - 2 * 1024 * 1024)
    m_pad = _round_up(M, tm)

    x2d = x.reshape(M, d_in).astype(w_dtype)
    if (m_pad, k_pad) != (M, d_in):
        x2d = jnp.pad(x2d, ((0, m_pad - M), (0, k_pad - d_in)))

    m_blocks = m_pad // tm
    n_blocks = n_pad // tn
    k_blocks = k_pad // tk
    out_dtype = x.dtype

    if multi_k:
        grid = (m_blocks, n_blocks, k_blocks)
        x_spec = pl.BlockSpec((tm, tk), lambda i, j, kk: (i, kk))
        w_spec = pl.BlockSpec((tk, tn), lambda i, j, kk: (kk, j))
        b_spec = pl.BlockSpec((1, tn), lambda i, j, kk: (0, j))
        o_spec = pl.BlockSpec((tm, tn), lambda i, j, kk: (i, j))
        scratch = [pltpu.VMEM((tm, tn), jnp.float32)] * 3
        dims = ("parallel", "arbitrary", "arbitrary")
        kernel = _qkv_kernel_multi
    else:
        grid = (m_blocks, n_blocks)
        x_spec = pl.BlockSpec((tm, tk), lambda i, j: (i, 0))
        w_spec = pl.BlockSpec((tk, tn), lambda i, j: (0, j))
        b_spec = pl.BlockSpec((1, tn), lambda i, j: (0, j))
        o_spec = pl.BlockSpec((tm, tn), lambda i, j: (i, j))
        scratch = []
        dims = ("parallel", "arbitrary")
        kernel = _qkv_kernel_single

    q2d, k2d, v2d = pl.pallas_call(
        kernel,
        out_shape=(jax.ShapeDtypeStruct((m_pad, n_pad), out_dtype),) * 3,
        grid_spec=pltpu.PrefetchScalarGridSpec(
            num_scalar_prefetch=0,
            grid=grid,
            in_specs=[x_spec, w_spec, w_spec, w_spec, b_spec, b_spec, b_spec],
            out_specs=(o_spec, o_spec, o_spec),
            scratch_shapes=scratch,
        ),
        compiler_params=pltpu.CompilerParams(
            dimension_semantics=dims,
            vmem_limit_bytes=vmem_limit,
        ),
    )(x2d, packed["wq"], packed["wk"], packed["wv"],
      packed["bq"], packed["bk"], packed["bv"])

    def unpad(o):
        if (m_pad, n_pad) != (M, d_h):
            o = o[:M, :d_h]
        return o.reshape(B, S, d_h)

    return unpad(q2d), unpad(k2d), unpad(v2d)


def init_params(key, input_dim, hidden_dim, dtype=jnp.float32):
    # Deterministic init mimicking nn.Linear's uniform(-1/sqrt(in), 1/sqrt(in)).
    ks = jax.random.split(key, 6)
    bound = 1.0 / (input_dim ** 0.5)
    u = lambda k, shape: jax.random.uniform(k, shape, dtype, minval=-bound, maxval=bound)
    return {
        "wq": u(ks[0], (hidden_dim, input_dim)),
        "bq": u(ks[1], (hidden_dim,)),
        "wk": u(ks[2], (hidden_dim, input_dim)),
        "bk": u(ks[3], (hidden_dim,)),
        "wv": u(ks[4], (hidden_dim, input_dim)),
        "bv": u(ks[5], (hidden_dim,)),
    }


if __name__ == "__main__":
    key = jax.random.PRNGKey(0)
    B, S, D_in, D_h = 2, 8, 32, 32

    k_x, k_p = jax.random.split(key)
    x = jax.random.normal(k_x, (B, S, D_in), dtype=jnp.float32)
    params = init_params(k_p, D_in, D_h)

    # Plain-JAX reference of the PyTorch semantics.
    q_ref = x @ params["wq"].T + params["bq"]
    k_ref = x @ params["wk"].T + params["bk"]
    v_ref = x @ params["wv"].T + params["bv"]

    # f32 path (exact check).
    packed = pack_qkv_params(params)                       # one-time packing
    q, k, v = transformer_layer_forward(x, packed)
    jax.block_until_ready((q, k, v))
    assert jnp.allclose(q, q_ref, atol=1e-5), "q mismatch (f32)"
    assert jnp.allclose(k, k_ref, atol=1e-5), "k mismatch (f32)"
    assert jnp.allclose(v, v_ref, atol=1e-5), "v mismatch (f32)"

    # bf16 production path (halved HBM traffic, MXU peak); loose tolerance check.
    packed_bf16 = pack_qkv_params(params, dtype=jnp.bfloat16)
    qb, kb, vb = transformer_layer_forward(x.astype(jnp.bfloat16), packed_bf16)
    jax.block_until_ready((qb, kb, vb))
    assert jnp.allclose(qb.astype(jnp.float32), q_ref, atol=5e-2, rtol=5e-2), "q mismatch (bf16)"
    assert jnp.allclose(kb.astype(jnp.float32), k_ref, atol=5e-2, rtol=5e-2), "k mismatch (bf16)"
    assert jnp.allclose(vb.astype(jnp.float32), v_ref, atol=5e-2, rtol=5e-2), "v mismatch (bf16)"

    print("KERNEL_OK")
</pallas_src>

<mosaic_0001>
module attributes {stable_mosaic.version = 11 : i64} {
  func.func @_qkv_kernel_single(%arg0: i32, %arg1: i32, %arg2: memref<16x128xf32, #tpu.memory_space<vmem>>, %arg3: memref<128x128xf32, #tpu.memory_space<vmem>>, %arg4: memref<128x128xf32, #tpu.memory_space<vmem>>, %arg5: memref<128x128xf32, #tpu.memory_space<vmem>>, %arg6: memref<1x128xf32, #tpu.memory_space<vmem>>, %arg7: memref<1x128xf32, #tpu.memory_space<vmem>>, %arg8: memref<1x128xf32, #tpu.memory_space<vmem>>, %arg9: memref<16x128xf32, #tpu.memory_space<vmem>>, %arg10: memref<16x128xf32, #tpu.memory_space<vmem>>, %arg11: memref<16x128xf32, #tpu.memory_space<vmem>>) attributes {dimension_semantics = [#tpu.dimension_semantics<parallel>, #tpu.dimension_semantics<arbitrary>], iteration_bounds = array<i64: 1, 1>, scalar_prefetch = 0 : i64, scratch_operands = 0 : i64, tpu.core_type = #tpu.core_type<tc>, window_params = [{transform_indices = @transform_0, window_bounds = array<i64: 16, 128>}, {transform_indices = @transform_1, window_bounds = array<i64: 128, 128>}, {transform_indices = @transform_2, window_bounds = array<i64: 128, 128>}, {transform_indices = @transform_3, window_bounds = array<i64: 128, 128>}, {transform_indices = @transform_4, window_bounds = array<i64: 1, 128>}, {transform_indices = @transform_5, window_bounds = array<i64: 1, 128>}, {transform_indices = @transform_6, window_bounds = array<i64: 1, 128>}, {transform_indices = @transform_7, window_bounds = array<i64: 16, 128>}, {transform_indices = @transform_8, window_bounds = array<i64: 16, 128>}, {transform_indices = @transform_9, window_bounds = array<i64: 16, 128>}]} {
    %c0 = arith.constant 0 : index
    %c0_0 = arith.constant 0 : index
    %0 = vector.load %arg2[%c0, %c0_0] : memref<16x128xf32, #tpu.memory_space<vmem>>, vector<16x128xf32>
    %c0_1 = arith.constant 0 : index
    %c0_2 = arith.constant 0 : index
    %1 = vector.load %arg3[%c0_1, %c0_2] : memref<128x128xf32, #tpu.memory_space<vmem>>, vector<128x128xf32>
    %cst = arith.constant dense<0.000000e+00> : vector<16x128xf32>
    %2 = tpu.matmul %0, %1, %cst {dimension_numbers = #tpu.dot_dimension_numbers<[1], [0], [0], [1], [0, 0, 1, 1], [], []>} : vector<16x128xf32>, vector<128x128xf32>, vector<16x128xf32> -> vector<16x128xf32>
    %c0_3 = arith.constant 0 : index
    %c0_4 = arith.constant 0 : index
    %3 = vector.load %arg6[%c0_3, %c0_4] : memref<1x128xf32, #tpu.memory_space<vmem>>, vector<1x128xf32>
    %4 = vector.broadcast %3 : vector<1x128xf32> to vector<16x128xf32>
    %5 = arith.addf %2, %4 : vector<16x128xf32>
    %c0_5 = arith.constant 0 : index
    %c0_6 = arith.constant 0 : index
    %6 = vector.load %arg9[%c0_5, %c0_6] : memref<16x128xf32, #tpu.memory_space<vmem>>, vector<16x128xf32>
    tpu.vector_store %arg9[%c0_5, %c0_6], %5 {strides = array<i32>} : memref<16x128xf32, #tpu.memory_space<vmem>>, vector<16x128xf32>,
    %c0_7 = arith.constant 0 : index
    %c0_8 = arith.constant 0 : index
    %7 = vector.load %arg4[%c0_7, %c0_8] : memref<128x128xf32, #tpu.memory_space<vmem>>, vector<128x128xf32>
    %cst_9 = arith.constant dense<0.000000e+00> : vector<16x128xf32>
    %8 = tpu.matmul %0, %7, %cst_9 {dimension_numbers = #tpu.dot_dimension_numbers<[1], [0], [0], [1], [0, 0, 1, 1], [], []>} : vector<16x128xf32>, vector<128x128xf32>, vector<16x128xf32> -> vector<16x128xf32>
    %c0_10 = arith.constant 0 : index
    %c0_11 = arith.constant 0 : index
    %9 = vector.load %arg7[%c0_10, %c0_11] : memref<1x128xf32, #tpu.memory_space<vmem>>, vector<1x128xf32>
    %10 = vector.broadcast %9 : vector<1x128xf32> to vector<16x128xf32>
    %11 = arith.addf %8, %10 : vector<16x128xf32>
    %c0_12 = arith.constant 0 : index
    %c0_13 = arith.constant 0 : index
    %12 = vector.load %arg10[%c0_12, %c0_13] : memref<16x128xf32, #tpu.memory_space<vmem>>, vector<16x128xf32>
    tpu.vector_store %arg10[%c0_12, %c0_13], %11 {strides = array<i32>} : memref<16x128xf32, #tpu.memory_space<vmem>>, vector<16x128xf32>,
    %c0_14 = arith.constant 0 : index
    %c0_15 = arith.constant 0 : index
    %13 = vector.load %arg5[%c0_14, %c0_15] : memref<128x128xf32, #tpu.memory_space<vmem>>, vector<128x128xf32>
    %cst_16 = arith.constant dense<0.000000e+00> : vector<16x128xf32>
    %14 = tpu.matmul %0, %13, %cst_16 {dimension_numbers = #tpu.dot_dimension_numbers<[1], [0], [0], [1], [0, 0, 1, 1], [], []>} : vector<16x128xf32>, vector<128x128xf32>, vector<16x128xf32> -> vector<16x128xf32>
    %c0_17 = arith.constant 0 : index
    %c0_18 = arith.constant 0 : index
    %15 = vector.load %arg8[%c0_17, %c0_18] : memref<1x128xf32, #tpu.memory_space<vmem>>, vector<1x128xf32>
    %16 = vector.broadcast %15 : vector<1x128xf32> to vector<16x128xf32>
    %17 = arith.addf %14, %16 : vector<16x128xf32>
    %c0_19 = arith.constant 0 : index
    %c0_20 = arith.constant 0 : index
    %18 = vector.load %arg11[%c0_19, %c0_20] : memref<16x128xf32, #tpu.memory_space<vmem>>, vector<16x128xf32>
    tpu.vector_store %arg11[%c0_19, %c0_20], %17 {strides = array<i32>} : memref<16x128xf32, #tpu.memory_space<vmem>>, vector<16x128xf32>,
    return
  }
  func.func @transform_0(%arg0: i32, %arg1: i32) -> (i32, i32) {
    %c0_i32 = arith.constant 0 : i32
    %c0_i32_0 = arith.constant 0 : i32
    return %arg0, %c0_i32 : i32, i32
  }
  func.func @transform_1(%arg0: i32, %arg1: i32) -> (i32, i32) {
    %c0_i32 = arith.constant 0 : i32
    %c0_i32_0 = arith.constant 0 : i32
    return %c0_i32, %arg1 : i32, i32
  }
  func.func @transform_2(%arg0: i32, %arg1: i32) -> (i32, i32) {
    %c0_i32 = arith.constant 0 : i32
    %c0_i32_0 = arith.constant 0 : i32
    return %c0_i32, %arg1 : i32, i32
  }
  func.func @transform_3(%arg0: i32, %arg1: i32) -> (i32, i32) {
    %c0_i32 = arith.constant 0 : i32
    %c0_i32_0 = arith.constant 0 : i32
    return %c0_i32, %arg1 : i32, i32
  }
  func.func @transform_4(%arg0: i32, %arg1: i32) -> (i32, i32) {
    %c0_i32 = arith.constant 0 : i32
    %c0_i32_0 = arith.constant 0 : i32
    return %c0_i32, %arg1 : i32, i32
  }
  func.func @transform_5(%arg0: i32, %arg1: i32) -> (i32, i32) {
    %c0_i32 = arith.constant 0 : i32
    %c0_i32_0 = arith.constant 0 : i32
    return %c0_i32, %arg1 : i32, i32
  }
  func.func @transform_6(%arg0: i32, %arg1: i32) -> (i32, i32) {
    %c0_i32 = arith.constant 0 : i32
    %c0_i32_0 = arith.constant 0 : i32
    return %c0_i32, %arg1 : i32, i32
  }
  func.func @transform_7(%arg0: i32, %arg1: i32) -> (i32, i32) {
    %c0_i32 = arith.constant 0 : i32
    return %arg0, %arg1 : i32, i32
  }
  func.func @transform_8(%arg0: i32, %arg1: i32) -> (i32, i32) {
    %c0_i32 = arith.constant 0 : i32
    return %arg0, %arg1 : i32, i32
  }
  func.func @transform_9(%arg0: i32, %arg1: i32) -> (i32, i32) {
    %c0_i32 = arith.constant 0 : i32
    return %arg0, %arg1 : i32, i32
  }
}

</mosaic_0001>

<bundles_post_ra>
// kernel: tpu_custom_call.1
= control target key start
LH: loop header
LB: loop body
LE: loop exit
PB: predicated region body
PF: predicated region fallthrough
CT: control target
= control target key end

     0   :  { %15 = vsyncpa [#allocation3], 0  ;;  %s1061_s0 = inlined_call_operand.hbm [shape: f32[16,128], index: 0, kind: input, shape index: {}]   ;;  %s1062_s1 = inlined_call_operand.hbm [shape: f32[128,128], index: 1, kind: input, shape index: {}]   ;;  %s1063_s2 = inlined_call_operand.hbm [shape: f32[128,128], index: 2, kind: input, shape index: {}]   ;;  %s1064_s3 = inlined_call_operand.hbm [shape: f32[128,128], index: 3, kind: input, shape index: {}]   ;;  %s1065_s4 = inlined_call_operand.vmem [shape: f32[1,128], index: 4, kind: input, shape index: {}]   ;;  %s1066_s5 = inlined_call_operand.vmem [shape: f32[1,128], index: 5, kind: input, shape index: {}]   ;;  %s1067_s6 = inlined_call_operand.vmem [shape: f32[1,128], index: 6, kind: input, shape index: {}]   ;;  %s1068_s7 = inlined_call_operand.hbm [shape: f32[16,128], index: 7, kind: output, shape index: {0}]   ;;  %s1069_s8 = inlined_call_operand.hbm [shape: f32[16,128], index: 8, kind: output, shape index: {1}]   ;;  %s1070_s9 = inlined_call_operand.hbm [shape: f32[16,128], index: 9, kind: output, shape index: {2}]  }
   0x1   :  { %16 = vsyncpa [#allocation6], 0 }
   0x2   :  { %17 = vsyncpa [#allocation9], 0 }
   0x3   :  { %18 = vsyncpa [#allocation4], 0 }
   0x4   :  { %19 = vsyncpa [#allocation12], 0  ;;  %s869_s30 = smov [#allocation5]   ;;  %s870_s11 = smov [#allocation2]  }
   0x5   :  { %s37_s10 = sshll.u32 %s869_s30, 4  ;;  %s25_s12 = sshll.u32 %s870_s11, 4  ;;  %s38_s10 = int_to_ptr.vmem [resolvable:$true] %s37_s10  ;;  %s928_s12 = int_to_ptr.vmem [resolvable:$true] %s25_s12 }
   0x6   :  { %s705_s15 = scalar_lea.hbm %s1062_s1, 2048 }
   0x7   :  { %p706_p0 = scmp.ne.s32.totalorder %s1062_s1, %s705_s15  ;;  %p709_p1 = scmp.lt.u32.totalorder %s705_s15, %s1062_s1 }
   0x9   :  { %p711_p2 = pnand %p709_p1, %p706_p0 }
   0xb   :  { %714 = shalt.err (!%p711_p2)
}
   0xc   :  { %s715_s20 = scalar_lea.vmem %s38_s10, 2048  ;;  %p720_p4 = scmp.lt.s32.totalorder %s38_s10, %s38_s10 }
   0xd   :  { %p716_p3 = scmp.ne.s32.totalorder %s38_s10, %s715_s20  ;;  %p721_p5 = scmp.lt.s32.totalorder %s715_s20, %s715_s20 }
   0xf   :  { %p722_p6 = por %p721_p5, %p720_p4 }
  0x11   :  { %p723_p7 = pnand %p722_p6, %p716_p3 }
  0x13   :  { %726 = shalt.err (!%p723_p7)
}
  0x14   :  { %s871_s21 = smov 128   ;;  %s872_s22 = smov 8  }
  0x15   :  { %43 = dma.hbm_to_vmem [thread:$0]  %s1062_s1, 2048, %s38_s10, [#allocation6], %s871_s21, %s871_s21, %s872_s22  }
  0x16   :  { %s727_s27 = scalar_lea.hbm %s1061_s0, 256 }
  0x17   :  { %p728_p8 = scmp.ne.s32.totalorder %s1061_s0, %s727_s27  ;;  %p731_p9 = scmp.lt.u32.totalorder %s727_s27, %s1061_s0 }
  0x19   :  { %p733_p10 = pnand %p731_p9, %p728_p8 }
  0x1b   :  { %736 = shalt.err (!%p733_p10)
}
  0x1c   :  { %s737_s13 = scalar_lea.vmem %s928_s12, 256  ;;  %p742_p12 = scmp.lt.s32.totalorder %s928_s12, %s928_s12 }
  0x1d   :  { %p738_p11 = scmp.ne.s32.totalorder %s928_s12, %s737_s13  ;;  %p743_p13 = scmp.lt.s32.totalorder %s737_s13, %s737_s13 }
  0x1f   :  { %p744_p0 = por %p743_p13, %p742_p12 }
  0x21   :  { %p745_p1 = pnand %p744_p0, %p738_p11 }
  0x23   :  { %748 = shalt.err (!%p745_p1)
}
  0x24   :  { %31 = dma.hbm_to_vmem [thread:$0]  %s1061_s0, 256, %s928_s12, [#allocation3], %s871_s21, %s871_s21, %s872_s22  }
  0x25   :  { %s873_s14 = smov [#allocation7]   ;;  %s874_s16 = smov [#allocation8]  }
  0x26   :  { %s49_s15 = sshll.u32 %s873_s14, 4  ;;  %s61_s17 = sshll.u32 %s874_s16, 4  ;;  %s50_s15 = int_to_ptr.vmem [resolvable:$true] %s49_s15  ;;  %s965_s17 = int_to_ptr.vmem [resolvable:$true] %s61_s17 }
  0x27   :  { %s749_s20 = scalar_lea.hbm %s1063_s2, 2048 }
  0x28   :  { %p750_p2 = scmp.ne.s32.totalorder %s1063_s2, %s749_s20  ;;  %p753_p3 = scmp.lt.u32.totalorder %s749_s20, %s1063_s2 }
  0x2a   :  { %p755_p4 = pnand %p753_p3, %p750_p2 }
  0x2c   :  { %758 = shalt.err (!%p755_p4)
}
  0x2d   :  { %s759_s0 = scalar_lea.vmem %s50_s15, 2048  ;;  %p764_p6 = scmp.lt.s32.totalorder %s50_s15, %s50_s15 }
  0x2e   :  { %p760_p5 = scmp.ne.s32.totalorder %s50_s15, %s759_s0  ;;  %p765_p7 = scmp.lt.s32.totalorder %s759_s0, %s759_s0 }
  0x30   :  { %p766_p8 = por %p765_p7, %p764_p6 }
  0x32   :  { %p767_p9 = pnand %p766_p8, %p760_p5 }
  0x34   :  { %770 = shalt.err (!%p767_p9)
}
  0x35   :  { %55 = dma.hbm_to_vmem [thread:$0]  %s1063_s2, 2048, %s50_s15, [#allocation6], %s871_s21, %s871_s21, %s872_s22  }
  0x36   :  { %s771_s30 = scalar_lea.hbm %s1064_s3, 2048 }
  0x37   :  { %p772_p10 = scmp.ne.s32.totalorder %s1064_s3, %s771_s30  ;;  %p775_p11 = scmp.lt.u32.totalorder %s771_s30, %s1064_s3 }
  0x39   :  { %p777_p12 = pnand %p775_p11, %p772_p10 }
  0x3b   :  { %780 = shalt.err (!%p777_p12)
}
  0x3c   :  { %s781_s14 = scalar_lea.vmem %s965_s17, 2048  ;;  %p786_p0 = scmp.lt.s32.totalorder %s965_s17, %s965_s17 }
  0x3d   :  { %p782_p13 = scmp.ne.s32.totalorder %s965_s17, %s781_s14  ;;  %p787_p1 = scmp.lt.s32.totalorder %s781_s14, %s781_s14 }
  0x3f   :  { %p788_p2 = por %p787_p1, %p786_p0 }
  0x41   :  { %p789_p3 = pnand %p788_p2, %p782_p13 }
  0x43   :  { %792 = shalt.err (!%p789_p3)
}
  0x44   :  { %67 = dma.hbm_to_vmem [thread:$0]  %s1064_s3, 2048, %s965_s17, [#allocation9], %s871_s21, %s871_s21, %s872_s22  }
  0x45   :  { %859 = dma.done.wait [#allocation3], 256  }
  0x46   :  { %860 = vsyncadd [#allocation3], 4294967040 }
  0x47   :  { %861 = dma.done.wait [#allocation6], 4096  }
  0x48   :  { %862 = vsyncadd [#allocation6], 4294963200 }
  0x49   :  { %863 = dma.done.wait [#allocation9], 2048  }
  0x4a   :  { %864 = vsyncadd [#allocation9], 4294965248  ;;  %v88_v0 = vld [vmem:[#allocation5] sm:$0xff]  ;;  %v89_v1 = vld [vmem:[#allocation5 + $0x8] sm:$0xff]  ;;  %s875_s17 = smov [#allocation10]   ;;  %s876_s23 = smov [#allocation11]  }
  0x4b   :  { %v90_v2 = vld [vmem:[#allocation5 + $0x10] sm:$0xff]  ;;  %v600_v3 = vpack.c.bf16 %v89_v1, %v88_v0  ;;  %v91_v4 = vld [vmem:[#allocation5 + $0x18] sm:$0xff]  ;;  %v92_v6 = vld [vmem:[#allocation5 + $0x20] sm:$0xff]  ;;  %s393_s18 = sshll.u32 %s875_s17, 4  ;;  %s405_s24 = sshll.u32 %s876_s23, 4  ;;  %s394_s18 = int_to_ptr.vmem [resolvable:$true] %s393_s18  ;;  %s406_s24 = int_to_ptr.vmem [resolvable:$true] %s405_s24 }
  0x4c   :  { %v604_v5 = vpack.c.bf16 %v91_v4, %v90_v2  ;;  %v93_v7 = vld [vmem:[#allocation5 + $0x28] sm:$0xff]  ;;  %v188_v9 = vld [vmem:[#allocation7] sm:$0xff]  ;;  %v94_v11 = vld [vmem:[#allocation5 + $0x30] sm:$0xff]  ;;  %s793_s25 = scalar_lea.vmem %s394_s18, 256  ;;  %p798_p5 = scmp.lt.s32.totalorder %s394_s18, %s394_s18 }
  0x4d   :  { %601 = vmatprep.subr.bf16.mxu0 %v600_v3  ;;  %v608_v8 = vpack.c.bf16 %v93_v7, %v92_v6  ;;  %v189_v10 = vld [vmem:[#allocation7 + $0x8] sm:$0xff]  ;;  %v95_v12 = vld [vmem:[#allocation5 + $0x38] sm:$0xff]  ;;  %v1002_v14 = vld [vmem:[#allocation2] sm:$0xff]  ;;  %p794_p4 = scmp.ne.s32.totalorder %s394_s18, %s793_s25  ;;  %p799_p6 = scmp.lt.s32.totalorder %s793_s25, %s793_s25 }
  0x4e   :  { %603 = vmatpush3.bf16.msra.mxu0 %v600_v3  ;;  %v632_v13 = vpack.c.bf16 %v189_v10, %v188_v9  ;;  %527 = vmatprep.mubr.f32.mxu0 %v1002_v14  ;;  %v190_v15 = vld [vmem:[#allocation7 + $0x10] sm:$0xff]  ;;  %v191_v16 = vld [vmem:[#allocation7 + $0x18] sm:$0xff]  ;;  %v192_v18 = vld [vmem:[#allocation7 + $0x20] sm:$0xff]  ;;  %v612_v19 = vpack.c.bf16 %v95_v12, %v94_v11 }
  0x4f   :  { %605 = vmatprep.subr.bf16.mxu0 %v604_v5  ;;  %562 = vmatprep.mubr.f32.mxu1 %v1002_v14  ;;  %v636_v17 = vpack.c.bf16 %v191_v16, %v190_v15  ;;  %v193_v20 = vld [vmem:[#allocation7 + $0x28] sm:$0xff]  ;;  %v96_v21 = vld [vmem:[#allocation5 + $0x40] sm:$0xff]  ;;  %v194_v24 = vld [vmem:[#allocation7 + $0x30] sm:$0xff]  ;;  %p800_p7 = por %p799_p6, %p798_p5 }
  0x50   :  { %633 = vmatprep.subr.bf16.mxu1 %v632_v13  ;;  %v97_v22 = vld [vmem:[#allocation5 + $0x48] sm:$0xff]  ;;  %v640_v23 = vpack.c.bf16 %v193_v20, %v192_v18  ;;  %v195_v25 = vld [vmem:[#allocation7 + $0x38] sm:$0xff]  ;;  %v98_v27 = vld [vmem:[#allocation5 + $0x50] sm:$0xff] }
  0x51   :  { %635 = vmatpush3.bf16.msra.mxu1 %v632_v13  ;;  %v616_v26 = vpack.c.bf16 %v97_v22, %v96_v21  ;;  %v99_v28 = vld [vmem:[#allocation5 + $0x58] sm:$0xff]  ;;  %v644_v29 = vpack.c.bf16 %v195_v25, %v194_v24  ;;  %v196_v30 = vld [vmem:[#allocation7 + $0x40] sm:$0xff]  ;;  %v197_v31 = vld [vmem:[#allocation7 + $0x48] sm:$0xff]  ;;  %p801_p8 = pnand %p800_p7, %p794_p4 }
  0x52   :  { %607 = vmatpush3.bf16.msra.mxu0 %v604_v5  ;;  %637 = vmatprep.subr.bf16.mxu1 %v636_v17  ;;  %v620_v32 = vpack.c.bf16 %v99_v28, %v98_v27  ;;  %v100_v33 = vld [vmem:[#allocation5 + $0x60] sm:$0xff]  ;;  %v101_v34 = vld [vmem:[#allocation5 + $0x68] sm:$0xff]  ;;  %v648_v35 = vpack.c.bf16 %v197_v31, %v196_v30  ;;  %v198_v36 = vld [vmem:[#allocation7 + $0x50] sm:$0xff] }
  0x53   :  { %609 = vmatprep.subr.bf16.mxu0 %v608_v8  ;;  %v199_v37 = vld [vmem:[#allocation7 + $0x58] sm:$0xff]  ;;  %v624_v38 = vpack.c.bf16 %v101_v34, %v100_v33  ;;  %v102_v39 = vld [vmem:[#allocation5 + $0x70] sm:$0xff]  ;;  %v200_v42 = vld [vmem:[#allocation7 + $0x60] sm:$0xff] }
  0x54   :  { %v103_v40 = vld [vmem:[#allocation5 + $0x78] sm:$0xff]  ;;  %v652_v41 = vpack.c.bf16 %v199_v37, %v198_v36  ;;  %v201_v43 = vld [vmem:[#allocation7 + $0x68] sm:$0xff]  ;;  %v288_v45 = vld [vmem:[#allocation8] sm:$0xff] }
  0x55   :  { %639 = vmatpush3.bf16.msra.mxu1 %v636_v17  ;;  %v628_v44 = vpack.c.bf16 %v103_v40, %v102_v39  ;;  %v289_v46 = vld [vmem:[#allocation8 + $0x8] sm:$0xff]  ;;  %v656_v47 = vpack.c.bf16 %v201_v43, %v200_v42  ;;  %v202_v48 = vld [vmem:[#allocation7 + $0x70] sm:$0xff]  ;;  %v203_v49 = vld [vmem:[#allocation7 + $0x78] sm:$0xff] }
  0x56   :  { %611 = vmatpush3.bf16.msra.mxu0 %v608_v8  ;;  %641 = vmatprep.subr.bf16.mxu1 %v640_v23  ;;  %v664_v50 = vpack.c.bf16 %v289_v46, %v288_v45  ;;  %v290_v51 = vld [vmem:[#allocation8 + $0x10] sm:$0xff]  ;;  %v291_v52 = vld [vmem:[#allocation8 + $0x18] sm:$0xff]  ;;  %v660_v53 = vpack.c.bf16 %v203_v49, %v202_v48  ;;  %v292_v56 = vld [vmem:[#allocation8 + $0x20] sm:$0xff] }
  0x57   :  { %613 = vmatprep.subr.bf16.mxu0 %v612_v19  ;;  %v87_v54 = vld [vmem:[#allocation2 + $0x8] sm:$0xff]  ;;  %v668_v55 = vpack.c.bf16 %v291_v52, %v290_v51  ;;  %v293_v57 = vld [vmem:[#allocation8 + $0x28] sm:$0xff]  ;;  %v294_v59 = vld [vmem:[#allocation8 + $0x30] sm:$0xff] }
  0x58   :  { %v672_v58 = vpack.c.bf16 %v293_v57, %v292_v56  ;;  %v295_v60 = vld [vmem:[#allocation8 + $0x38] sm:$0xff]  ;;  %v296_v62 = vld [vmem:[#allocation8 + $0x40] sm:$0xff]  ;;  %v297_v63 = vld [vmem:[#allocation8 + $0x48] sm:$0xff] }
  0x59   :  { %643 = vmatpush3.bf16.msra.mxu1 %v640_v23  ;;  %v676_v61 = vpack.c.bf16 %v295_v60, %v294_v59  ;;  %v680_v0 = vpack.c.bf16 %v297_v63, %v296_v62  ;;  %v298_v1 = vld [vmem:[#allocation8 + $0x50] sm:$0xff]  ;;  %v299_v2 = vld [vmem:[#allocation8 + $0x58] sm:$0xff]  ;;  %v300_v4 = vld [vmem:[#allocation8 + $0x60] sm:$0xff] }
  0x5a   :  { %615 = vmatpush3.bf16.msra.mxu0 %v612_v19  ;;  %645 = vmatprep.subr.bf16.mxu1 %v644_v29  ;;  %v684_v3 = vpack.c.bf16 %v299_v2, %v298_v1  ;;  %v301_v5 = vld [vmem:[#allocation8 + $0x68] sm:$0xff]  ;;  %v302_v7 = vld [vmem:[#allocation8 + $0x70] sm:$0xff]  ;;  %v303_v8 = vld [vmem:[#allocation8 + $0x78] sm:$0xff] }
  0x5b   :  { %617 = vmatprep.subr.bf16.mxu0 %v616_v26  ;;  %v688_v6 = vpack.c.bf16 %v301_v5, %v300_v4  ;;  %v692_v9 = vpack.c.bf16 %v303_v8, %v302_v7  ;;  %v438_v10 = vld [vmem:[%s1065_s4] ss:$0 sm:$0xff] }
  0x5c   :  { %v439_v15 = vld [vmem:[%s1066_s5] ss:$0 sm:$0xff] }
  0x5d   :  { %647 = vmatpush3.bf16.msra.mxu1 %v644_v29 }
  0x5e   :  { %619 = vmatpush3.bf16.msra.mxu0 %v616_v26  ;;  %649 = vmatprep.subr.bf16.mxu1 %v648_v35 }
  0x5f   :  { %621 = vmatprep.subr.bf16.mxu0 %v620_v32 }
  0x61   :  { %651 = vmatpush3.bf16.msra.mxu1 %v648_v35 }
  0x62   :  { %623 = vmatpush3.bf16.msra.mxu0 %v620_v32  ;;  %653 = vmatprep.subr.bf16.mxu1 %v652_v41 }
  0x63   :  { %625 = vmatprep.subr.bf16.mxu0 %v624_v38 }
  0x65   :  { %655 = vmatpush3.bf16.msra.mxu1 %v652_v41 }
  0x66   :  { %627 = vmatpush3.bf16.msra.mxu0 %v624_v38  ;;  %657 = vmatprep.subr.bf16.mxu1 %v656_v47 }
  0x67   :  { %629 = vmatprep.subr.bf16.mxu0 %v628_v44 }
  0x69   :  { %659 = vmatpush3.bf16.msra.mxu1 %v656_v47 }
  0x6a   :  { %631 = vmatpush3.bf16.msra.mxu0 %v628_v44  ;;  %661 = vmatprep.subr.bf16.mxu1 %v660_v53 }
  0x6b   :  { %665 = vmatprep.subr.bf16.mxu0 %v664_v50 }
  0x6d   :  { %528 = vmatmul.mubr.f32.vlgmr.msra.gmra.mrb[0].mxu0 %v87_v54  ;;  %663 = vmatpush3.bf16.msra.mxu1 %v660_v53 }
  0x6e   :  { %667 = vmatpush3.bf16.msra.mxu0 %v664_v50  ;;  %597 = vmatprep.mubr.f32.mxu0 %v1002_v14 }
  0x6f   :  { %669 = vmatprep.subr.bf16.mxu0 %v668_v55 }
  0x70   :  { %563 = vmatmul.mubr.f32.vlgmr.msra.gmra.mrb[0].mxu1 %v87_v54 }
  0x72   :  { %671 = vmatpush3.bf16.msra.mxu0 %v668_v55 }
  0x73   :  { %673 = vmatprep.subr.bf16.mxu0 %v672_v58 }
  0x76   :  { %675 = vmatpush3.bf16.msra.mxu0 %v672_v58 }
  0x77   :  { %677 = vmatprep.subr.bf16.mxu0 %v676_v61 }
  0x7a   :  { %679 = vmatpush3.bf16.msra.mxu0 %v676_v61 }
  0x7b   :  { %681 = vmatprep.subr.bf16.mxu0 %v680_v0 }
  0x7e   :  { %683 = vmatpush3.bf16.msra.mxu0 %v680_v0 }
  0x7f   :  { %685 = vmatprep.subr.bf16.mxu0 %v684_v3 }
  0x82   :  { %687 = vmatpush3.bf16.msra.mxu0 %v684_v3 }
  0x83   :  { %689 = vmatprep.subr.bf16.mxu0 %v688_v6 }
  0x86   :  { %691 = vmatpush3.bf16.msra.mxu0 %v688_v6 }
  0x87   :  { %693 = vmatprep.subr.bf16.mxu0 %v692_v9 }
  0x8a   :  { %695 = vmatpush3.bf16.msra.mxu0 %v692_v9 }
  0x8d   :  { %598 = vmatmul.mubr.f32.vlgmr.msra.gmra.mrb[2].mxu0 %v87_v54 }
 0x140   :  { %v529_v11 = vpop.f32.mrb[0].mxu0 }
 0x141   :  { %v183_v12 = vadd.f32 %v529_v11, %v438_v10  ;;  %v177_v13 = vpop.f32.mrb[1].mxu0 }
 0x142   :  { %v178_v14 = vadd.f32 %v438_v10, %v177_v13 }
 0x143   :  { %187 = vst [vmem:[#allocation10 + $0x8] sm:$0xff] %v183_v12  ;;  %v564_v16 = vpop.f32.mrb[0].mxu1 }
 0x144   :  { %186 = vst [vmem:[#allocation10] sm:$0xff] %v178_v14 }
 0x145   :  { %804 = shalt.err (!%p801_p8)
}
 0x146   :  { %s805_s0 = scalar_lea.hbm %s1068_s7, 256 }
 0x147   :  { %p806_p9 = scmp.ne.s32.totalorder %s1068_s7, %s805_s0  ;;  %p809_p10 = scmp.lt.u32.totalorder %s805_s0, %s1068_s7 }
 0x149   :  { %p811_p11 = pnand %p809_p10, %p806_p9 }
 0x14b   :  { %814 = shalt.err (!%p811_p11)
}
 0x14c   :  { %399 = dma.vmem_to_hbm [thread:$0]  %s394_s18, 256, %s1068_s7, [#allocation4], %s871_s21, %s871_s21, %s872_s22   ;;  %v283_v17 = vadd.f32 %v564_v16, %v439_v15  ;;  %v277_v18 = vpop.f32.mrb[1].mxu1 }
 0x14d   :  { %v278_v19 = vadd.f32 %v439_v15, %v277_v18  ;;  %s815_s11 = scalar_lea.vmem %s406_s24, 256  ;;  %p820_p13 = scmp.lt.s32.totalorder %s406_s24, %s406_s24 }
 0x14e   :  { %287 = vst [vmem:[#allocation11 + $0x8] sm:$0xff] %v283_v17  ;;  %p816_p12 = scmp.ne.s32.totalorder %s406_s24, %s815_s11  ;;  %p821_p0 = scmp.lt.s32.totalorder %s815_s11, %s815_s11 }
 0x14f   :  { %286 = vst [vmem:[#allocation11] sm:$0xff] %v278_v19 }
 0x150   :  { %p822_p1 = por %p821_p0, %p820_p13 }
 0x152   :  { %p823_p2 = pnand %p822_p1, %p816_p12 }
 0x154   :  { %826 = shalt.err (!%p823_p2)
}
 0x155   :  { %s827_s10 = scalar_lea.hbm %s1069_s8, 256 }
 0x156   :  { %p828_p3 = scmp.ne.s32.totalorder %s1069_s8, %s827_s10  ;;  %p831_p4 = scmp.lt.u32.totalorder %s827_s10, %s1069_s8 }
 0x158   :  { %p833_p5 = pnand %p831_p4, %p828_p3 }
 0x15a   :  { %836 = shalt.err (!%p833_p5)
}
 0x15b   :  { %411 = dma.vmem_to_hbm [thread:$0]  %s406_s24, 256, %s1069_s8, [#allocation12], %s871_s21, %s871_s21, %s872_s22  }
 0x15c   :  { %v440_v20 = vld [vmem:[%s1067_s6] ss:$0 sm:$0xff]  ;;  %s877_s19 = smov [#allocation13]  }
 0x15d   :  { %s417_s20 = sshll.u32 %s877_s19, 4  ;;  %s418_s20 = int_to_ptr.vmem [resolvable:$true] %s417_s20 }
 0x15e   :  { %s837_s23 = scalar_lea.vmem %s418_s20, 256  ;;  %p842_p7 = scmp.lt.s32.totalorder %s418_s20, %s418_s20 }
 0x15f   :  { %p838_p6 = scmp.ne.s32.totalorder %s418_s20, %s837_s23  ;;  %p843_p8 = scmp.lt.s32.totalorder %s837_s23, %s837_s23 }
 0x160   :  { %v599_v21 = vpop.f32.mrb[2].mxu0 }
 0x161   :  { %v383_v22 = vadd.f32 %v599_v21, %v440_v20  ;;  %v377_v23 = vpop.f32.mrb[3].mxu0  ;;  %p844_p9 = por %p843_p8, %p842_p7 }
 0x162   :  { %v378_v24 = vadd.f32 %v440_v20, %v377_v23 }
 0x163   :  { %387 = vst [vmem:[#allocation13 + $0x8] sm:$0xff] %v383_v22  ;;  %p845_p10 = pnand %p844_p9, %p838_p6 }
 0x164   :  { %386 = vst [vmem:[#allocation13] sm:$0xff] %v378_v24 }
 0x165   :  { %848 = shalt.err (!%p845_p10)
}
 0x166   :  { %s849_s6 = scalar_lea.hbm %s1070_s9, 256 }
 0x167   :  { %p850_p11 = scmp.ne.s32.totalorder %s1070_s9, %s849_s6  ;;  %p853_p12 = scmp.lt.u32.totalorder %s849_s6, %s1070_s9 }
 0x169   :  { %p855_p13 = pnand %p853_p12, %p850_p11 }
 0x16b   :  { %858 = shalt.err (!%p855_p13)
}
 0x16c   :  { %423 = dma.vmem_to_hbm [thread:$0]  %s418_s20, 256, %s1070_s9, [#allocation12], %s871_s21, %s871_s21, %s872_s22  }
 0x16d   :  { %865 = dma.done.wait [#allocation4], 256  }
 0x16e   :  { %866 = vsyncadd [#allocation4], 4294967040 }
 0x16f   :  { %867 = dma.done.wait [#allocation12], 512  }
 0x170   :  { %868 = vsyncadd [#allocation12], 4294966784 }
 0x171   :  { %433 = vsyncpa [#allocation3], 1 }
 0x172   :  { %434 = vsyncpa [#allocation6], 1 }
 0x173   :  { %435 = vsyncpa [#allocation9], 1 }
 0x174   :  { %436 = vsyncpa [#allocation4], 1 }
 0x175   :  { %437 = vsyncpa [#allocation12], 1 }

</bundles_post_ra>
